<compile_context>
chip_gen: v5e
topology: v5e:2x2
jax: 0.10.0
libtpu: 0.0.40
codegen_flags: <defaults>
</compile_context>

<pallas_src>
import jax
import jax.numpy as jnp
from jax.experimental import pallas as pl
from jax.experimental.pallas import tpu as pltpu

_EPS = 1e-12
_LANES = 128
_SUBLANES = 8


def _cdiv(a, b):
    return -(-a // b)


def _round_down(x, m):
    return (x // m) * m


def _sublane_multiple(dtype):
    # (8,128) min tile holds for 4-byte dtypes; sub-32-bit dtypes pack along sublanes:
    # bf16 -> (16,128), int8/fp8 -> (32,128).
    itemsize = max(1, jnp.dtype(dtype).itemsize)
    return max(_SUBLANES, (_SUBLANES * 4) // itemsize)


def _chip_config():
    """Returns (num_splits, split_axis_semantics, max_tile_rows, vmem_limit_bytes)."""
    kind = ""
    try:
        kind = jax.devices()[0].device_kind.lower()
    except Exception:
        pass
    if "7" in kind:
        # v7x: 2 TensorCores/chip, 3.2 TB/s HBM -> biggest tiles + explicit core split.
        return 2, pltpu.CORE_PARALLEL, 4096, 24 * 1024 * 1024
    if "v6" in kind:
        # v6e: single TC; 4096-row tiles (12 MiB double-buffered inputs) need a raised limit.
        return 1, None, 4096, 24 * 1024 * 1024
    if "v5 lite" in kind or "v5e" in kind or "v5lite" in kind:
        # v5e: 16 MiB scoped-VMEM default -> 2048-row tiles (6 MiB of input buffers).
        return 1, None, 2048, None
    return 1, None, 2048, None  # unknown chip: conservative


def _poisson_split_kernel(pred_ref, true_ref, imgv_ref, out_ref):
    j = pl.program_id(1)

    @pl.when(j == 0)
    def _():
        out_ref[...] = jnp.zeros_like(out_ref)

    b = pred_ref[...].astype(jnp.float32)
    xt = true_ref[...].astype(jnp.float32)
    xv = imgv_ref[...].astype(jnp.float32)
    log_b = jnp.log(b + _EPS)

    # Fused: NLL(x_true | b) + NLL(x_imgv | b) = sum( 2*b - (x_true + x_imgv) * log b )
    contrib = (b + b) - (xt + xv) * log_b                               # (tile_rows, 128)
    # Pure-VPU per-sublane/per-lane partial reduction (no cross-lane XLU reduce here).
    partial = jnp.sum(contrib.reshape(-1, _SUBLANES, _LANES), axis=0)   # (8, 128)

    # Output block is resident across the "arbitrary" row axis -> accumulate in place.
    out_ref[0] = out_ref[0] + partial


def _tail_sum(pred, true, imgv):
    b = pred.astype(jnp.float32)
    log_b = jnp.log(b + _EPS)
    return jnp.sum((b + b) - (true.astype(jnp.float32) + imgv.astype(jnp.float32)) * log_b)


def _mle_and_poisson_split_impl(predictions, true, img_v):
    """predictions, true, img_v: arrays (e.g. NCHW) of identical shape."""
    assert predictions.shape == true.shape == img_v.shape
    flat_p = predictions.reshape(-1)
    flat_t = true.reshape(-1)
    flat_v = img_v.reshape(-1)
    total = flat_p.shape[0]

    num_splits, split_sem, max_tile_rows, vmem_limit = _chip_config()
    sub = max(_sublane_multiple(a.dtype) for a in (flat_p, flat_t, flat_v))

    lane_rows = total // _LANES
    lane_total = lane_rows * _LANES

    loss = jnp.float32(0.0)
    covered = 0

    if lane_rows >= sub:
        if lane_rows < num_splits * sub:
            num_splits = 1

        # Near-even coverage: pick the block count first, then the largest legal tile.
        blocks_per_split = _cdiv(lane_rows, num_splits * max_tile_rows)
        tile_rows = _round_down(lane_rows // (num_splits * blocks_per_split), sub)
        main_rows = num_splits * blocks_per_split * tile_rows  # <= lane_rows, tail -> XLA
        covered = main_rows * _LANES

        def _slab(flat):
            # Zero-copy when total is a multiple of 128 (the common case); a single
            # prefix-slice copy otherwise.  The grid only touches the first main_rows
            # rows, so no padding is ever required.
            if lane_total != total:
                flat = flat[:lane_total]
            return flat.reshape(lane_rows, _LANES)

        pred2d, true2d, imgv2d = _slab(flat_p), _slab(flat_t), _slab(flat_v)

        in_spec = pl.BlockSpec((tile_rows, _LANES),
                               lambda c, j: (c * blocks_per_split + j, 0))
        out_spec = pl.BlockSpec((1, _SUBLANES, _LANES), lambda c, j: (c, 0, 0))

        if num_splits > 1 and split_sem is not None:
            dim_sems = (split_sem, pltpu.ARBITRARY)       # v7x: shard across both TCs
        else:
            dim_sems = (pltpu.ARBITRARY, pltpu.ARBITRARY)

        in_bytes = sum(main_rows * _LANES * jnp.dtype(a.dtype).itemsize
                       for a in (pred2d, true2d, imgv2d))
        cost = pl.CostEstimate(
            flops=6 * covered,
            transcendentals=covered,
            bytes_accessed=in_bytes + num_splits * _SUBLANES * _LANES * 4,
        )

        partials = pl.pallas_call(
            _poisson_split_kernel,
            out_shape=jax.ShapeDtypeStruct((num_splits, _SUBLANES, _LANES), jnp.float32),
            grid_spec=pltpu.PrefetchScalarGridSpec(
                num_scalar_prefetch=0,
                grid=(num_splits, blocks_per_split),
                in_specs=[in_spec, in_spec, in_spec],
                out_specs=out_spec,
            ),
            compiler_params=pltpu.CompilerParams(
                dimension_semantics=dim_sems,
                vmem_limit_bytes=vmem_limit,
            ),
            cost_estimate=cost,
        )(pred2d, true2d, imgv2d)

        loss = jnp.sum(partials)  # tiny (num_splits, 8, 128) final reduce

    if covered < total:
        # Ragged tail (< ~num_splits*blocks*sub rows + 128 elems): plain XLA reduce.
        loss = loss + _tail_sum(flat_p[covered:], flat_t[covered:], flat_v[covered:])

    return loss


mle_and_poisson_split = jax.jit(_mle_and_poisson_split_impl)


def _reference(predictions, true, img_v):
    b = predictions.astype(jnp.float32)
    log_b = jnp.log(b + _EPS)
    nll1 = jnp.sum(b - true.astype(jnp.float32) * log_b)
    nll2 = jnp.sum(b - img_v.astype(jnp.float32) * log_b)
    return nll1 + nll2


if __name__ == "__main__":
    key = jax.random.PRNGKey(0)
    k1, k2, k3 = jax.random.split(key, 3)

    B, C, H, W = 2, 4, 16, 16  # NCHW, total = 2048 elements
    # Strictly positive rates / non-negative counts.
    predictions = jax.random.uniform(k1, (B, C, H, W), jnp.float32, 0.1, 5.0)
    true = jax.random.uniform(k2, (B, C, H, W), jnp.float32, 0.0, 5.0)
    img_v = jax.random.uniform(k3, (B, C, H, W), jnp.float32, 0.0, 5.0)

    loss = jax.block_until_ready(mle_and_poisson_split(predictions, true, img_v))

    ref = _reference(predictions, true, img_v)
    assert jnp.allclose(loss, ref, rtol=1e-5, atol=1e-2), (loss, ref)

    print("KERNEL_OK")
</pallas_src>

<mosaic_0001>
module attributes {stable_mosaic.version = 11 : i64} {
  func.func @_poisson_split_kernel(%arg0: i32, %arg1: i32, %arg2: memref<16x128xf32, #tpu.memory_space<vmem>>, %arg3: memref<16x128xf32, #tpu.memory_space<vmem>>, %arg4: memref<16x128xf32, #tpu.memory_space<vmem>>, %arg5: memref<1x8x128xf32, #tpu.memory_space<vmem>>) attributes {dimension_semantics = [#tpu.dimension_semantics<arbitrary>, #tpu.dimension_semantics<arbitrary>], iteration_bounds = array<i64: 1, 1>, scalar_prefetch = 0 : i64, scratch_operands = 0 : i64, tpu.core_type = #tpu.core_type<tc>, window_params = [{transform_indices = @transform_0, window_bounds = array<i64: 16, 128>}, {transform_indices = @transform_1, window_bounds = array<i64: 16, 128>}, {transform_indices = @transform_2, window_bounds = array<i64: 16, 128>}, {transform_indices = @transform_3, window_bounds = array<i64: 1, 8, 128>}]} {
    %c0_i32 = arith.constant 0 : i32
    %0 = arith.cmpi eq, %arg1, %c0_i32 : i32
    %1 = arith.extui %0 : i1 to i32
    %c0_i32_0 = arith.constant 0 : i32
    %2 = arith.cmpi ne, %1, %c0_i32_0 : i32
    scf.if %2 {
      %cst_13 = arith.constant 0.000000e+00 : f32
      %21 = vector.broadcast %cst_13 : f32 to vector<1x8x128xf32>
      %c0_14 = arith.constant 0 : index
      %c0_15 = arith.constant 0 : index
      %c0_16 = arith.constant 0 : index
      %22 = vector.load %arg5[%c0_14, %c0_15, %c0_16] : memref<1x8x128xf32, #tpu.memory_space<vmem>>, vector<1x8x128xf32>
      tpu.vector_store %arg5[%c0_14, %c0_15, %c0_16], %21 {strides = array<i32>} : memref<1x8x128xf32, #tpu.memory_space<vmem>>, vector<1x8x128xf32>,
    } else {
    }
    %c0 = arith.constant 0 : index
    %c0_1 = arith.constant 0 : index
    %3 = vector.load %arg2[%c0, %c0_1] : memref<16x128xf32, #tpu.memory_space<vmem>>, vector<16x128xf32>
    %c0_2 = arith.constant 0 : index
    %c0_3 = arith.constant 0 : index
    %4 = vector.load %arg3[%c0_2, %c0_3] : memref<16x128xf32, #tpu.memory_space<vmem>>, vector<16x128xf32>
    %c0_4 = arith.constant 0 : index
    %c0_5 = arith.constant 0 : index
    %5 = vector.load %arg4[%c0_4, %c0_5] : memref<16x128xf32, #tpu.memory_space<vmem>>, vector<16x128xf32>
    %cst = arith.constant 9.99999996E-13 : f32
    %6 = vector.broadcast %cst : f32 to vector<16x128xf32>
    %7 = arith.addf %3, %6 : vector<16x128xf32>
    %8 = math.log %7 : vector<16x128xf32>
    %9 = arith.addf %3, %3 : vector<16x128xf32>
    %10 = arith.addf %4, %5 : vector<16x128xf32>
    %11 = arith.mulf %10, %8 : vector<16x128xf32>
    %12 = arith.subf %9, %11 : vector<16x128xf32>
    %13 = vector.shape_cast %12 : vector<16x128xf32> to vector<2x8x128xf32>
    %cst_6 = arith.constant dense<0.000000e+00> : vector<8x128xf32>
    %14 = vector.multi_reduction <add>, %13, %cst_6 [0] : vector<2x8x128xf32> to vector<8x128xf32>
    %c0_7 = arith.constant 0 : index
    %c0_8 = arith.constant 0 : index
    %c0_9 = arith.constant 0 : index
    %15 = vector.load %arg5[%c0_7, %c0_8, %c0_9] : memref<1x8x128xf32, #tpu.memory_space<vmem>>, vector<1x8x128xf32>
    %16 = vector.shape_cast %15 : vector<1x8x128xf32> to vector<8x128xf32>
    %17 = arith.addf %16, %14 : vector<8x128xf32>
    %c0_10 = arith.constant 0 : index
    %c0_11 = arith.constant 0 : index
    %c0_12 = arith.constant 0 : index
    %18 = vector.load %arg5[%c0_10, %c0_11, %c0_12] : memref<1x8x128xf32, #tpu.memory_space<vmem>>, vector<1x8x128xf32>
    %19 = vector.shape_cast %18 : vector<1x8x128xf32> to vector<8x128xf32>
    %20 = vector.shape_cast %17 : vector<8x128xf32> to vector<1x8x128xf32>
    tpu.vector_store %arg5[%c0_10, %c0_11, %c0_12], %20 {strides = array<i32>} : memref<1x8x128xf32, #tpu.memory_space<vmem>>, vector<1x8x128xf32>,
    return
  }
  func.func @transform_0(%arg0: i32, %arg1: i32) -> (i32, i32) {
    %c1_i32 = arith.constant 1 : i32
    %0 = arith.muli %arg0, %c1_i32 : i32
    %1 = arith.addi %0, %arg1 : i32
    %c0_i32 = arith.constant 0 : i32
    %c0_i32_0 = arith.constant 0 : i32
    return %1, %c0_i32 : i32, i32
  }
  func.func @transform_1(%arg0: i32, %arg1: i32) -> (i32, i32) {
    %c1_i32 = arith.constant 1 : i32
    %0 = arith.muli %arg0, %c1_i32 : i32
    %1 = arith.addi %0, %arg1 : i32
    %c0_i32 = arith.constant 0 : i32
    %c0_i32_0 = arith.constant 0 : i32
    return %1, %c0_i32 : i32, i32
  }
  func.func @transform_2(%arg0: i32, %arg1: i32) -> (i32, i32) {
    %c1_i32 = arith.constant 1 : i32
    %0 = arith.muli %arg0, %c1_i32 : i32
    %1 = arith.addi %0, %arg1 : i32
    %c0_i32 = arith.constant 0 : i32
    %c0_i32_0 = arith.constant 0 : i32
    return %1, %c0_i32 : i32, i32
  }
  func.func @transform_3(%arg0: i32, %arg1: i32) -> (i32, i32, i32) {
    %c0_i32 = arith.constant 0 : i32
    %c0_i32_0 = arith.constant 0 : i32
    %c0_i32_1 = arith.constant 0 : i32
    return %arg0, %c0_i32, %c0_i32_0 : i32, i32, i32
  }
}

</mosaic_0001>

<bundles_post_ra>
// kernel: _mle_and_poisson_split_impl.1
= control target key start
LH: loop header
LB: loop body
LE: loop exit
PB: predicated region body
PF: predicated region fallthrough
CT: control target
= control target key end

     0   :  { %s177_s0 = inlined_call_operand.vmem [shape: f32[16,128], index: 0, kind: input, shape index: {}]   ;;  %s178_s1 = inlined_call_operand.vmem [shape: f32[16,128], index: 1, kind: input, shape index: {}]   ;;  %s179_s2 = inlined_call_operand.vmem [shape: f32[16,128], index: 2, kind: input, shape index: {}]   ;;  %s180_s3 = inlined_call_operand.vmem [shape: f32[1,8,128], index: 3, kind: output, shape index: {}]  }
   0x1   :  { %v85_v0 = vld [vmem:[%s177_s0] sm:$0xff]  ;;  %v86_v1 = vld [vmem:[%s177_s0 + $0x8] sm:$0xff] }
   0x2   :  { %v91_v2 = vadd.f32 1e-12, %v85_v0  ;;  %v92_v3 = vadd.f32 1e-12, %v86_v1  ;;  %v87_v4 = vld [vmem:[%s178_s1] sm:$0xff]  ;;  %v88_v6 = vld [vmem:[%s178_s1 + $0x8] sm:$0xff]  ;;  %v97_v13 = vadd.f32 %v85_v0, %v85_v0  ;;  %v98_v15 = vadd.f32 %v86_v1, %v86_v1 }
   0x3   :  { %v89_v5 = vld [vmem:[%s179_s2] sm:$0xff]  ;;  %v90_v7 = vld [vmem:[%s179_s2 + $0x8] sm:$0xff] }
   0x4   :  { %132 = vlog2.f32 %v91_v2  ;;  %v99_v8 = vadd.f32 %v89_v5, %v87_v4  ;;  %v100_v10 = vadd.f32 %v90_v7, %v88_v6 }
   0x5   :  { %134 = vlog2.f32 %v92_v3 }
   0xa   :  { %v133_v9 = vpop.eup %132 }
   0xb   :  { %v135_v11 = vpop.eup %134  ;;  %v94_v12 = vmul.f32 0.6931472, %v133_v9 }
   0xc   :  { %v96_v14 = vmul.f32 0.6931472, %v135_v11 }
   0xd   :  { %v101_v16 = vmul.f32 %v99_v8, %v94_v12 }
   0xe   :  { %v102_v17 = vmul.f32 %v100_v10, %v96_v14 }
   0xf   :  { %v103_v18 = vsub.f32 %v97_v13, %v101_v16 }
  0x10   :  { %v104_v19 = vsub.f32 %v98_v15, %v102_v17 }
  0x12   :  { %v105_v20 = vadd.f32 %v104_v19, %v103_v18 }
  0x14   :  { %108 = vst [vmem:[%s180_s3] sm:$0xff] %v105_v20 }

</bundles_post_ra>
